<compile_context>
chip_gen: v6e
topology: v6e:2x2x1
jax: 0.10.0
libtpu: 0.0.40
codegen_flags: <defaults>
</compile_context>

<pallas_src>
import jax
import jax.numpy as jnp
import numpy as np
from jax.experimental import pallas as pl
from jax.experimental.pallas import tpu as pltpu

HIDDEN = 32        # hidden_size (small, consistent with the module)
VOCAB = 64         # output_size
MAX_LENGTH = 10    # max_length
BATCH = 8          # independent decoder streams (fills sublanes / MXU rows)
T_STEPS = 8        # decoder steps run inside the kernel
PACK = 128         # lane-dense packed output width: [logp | h | attn_w | pad]


def attn_decoder_kernel(tok_ref,                      # (1, B, 1) int32 token ids for step t
                        emb_ref,                      # (V, H)   embedding table  (resident)
                        h0_ref,                       # (B, H)   initial hidden   (resident)
                        enc_ref,                      # (L, H)   encoder outputs  (resident)
                        attn_wT_ref, attn_b_ref,      # (2H, L), (1, L)
                        comb_wT_ref, comb_b_ref,      # (2H, H), (1, H)
                        gru_wT_ref, gru_b_ref,        # (2H, 6H) block-diag, (1, 6H)
                        out_wT_ref, out_b_ref,        # (H, V),  (1, V)
                        packed_ref,                   # (1, B, PACK) packed step outputs
                        h_sc, cat_sc):                # VMEM scratch: (B, H), (B, 2H)
    B, H = h_sc.shape
    V = emb_ref.shape[0]
    L = enc_ref.shape[0]

    # hidden state is carried across grid steps in VMEM scratch
    @pl.when(pl.program_id(0) == 0)
    def _():
        h_sc[...] = h0_ref[...]

    h = h_sc[...]                                               # (B, H)

    # embedded = embedding(input)  -- one-hot @ table on the MXU
    # TODO(synk): dropout implemented as eval-mode identity (no RNG mask).
    tok = tok_ref[0]                                            # (B, 1) int32
    vocab_ids = jax.lax.broadcasted_iota(jnp.int32, (B, V), 1)  # (B, V)
    onehot = jnp.where(tok == vocab_ids, 1.0, 0.0)              # (B, V) f32
    embedded = jnp.dot(onehot, emb_ref[...],
                       preferred_element_type=jnp.float32)      # (B, H)

    # attn_weights = softmax(attn(cat(embedded, hidden)), dim=1)
    cat_sc[:, 0:H] = embedded
    cat_sc[:, H:2 * H] = h
    attn_logits = (jnp.dot(cat_sc[...], attn_wT_ref[...],
                           preferred_element_type=jnp.float32)
                   + attn_b_ref[...])                           # (B, L)
    m = jnp.max(attn_logits, axis=1, keepdims=True)
    e = jnp.exp(attn_logits - m)
    denom = jnp.sum(e, axis=1, keepdims=True)
    attn_w = e * pl.reciprocal(denom, approx=True)              # (B, L)

    # attn_applied = bmm(attn_weights, encoder_outputs)
    attn_applied = jnp.dot(attn_w, enc_ref[...],
                           preferred_element_type=jnp.float32)  # (B, H)

    # output = relu(attn_combine(cat(embedded, attn_applied)))
    cat_sc[:, H:2 * H] = attn_applied                           # [:, :H] still holds embedded
    x = (jnp.dot(cat_sc[...], comb_wT_ref[...],
                 preferred_element_type=jnp.float32)
         + comb_b_ref[...])                                     # (B, H)
    x = jnp.maximum(x, 0.0)

    # single-step GRU cell; both gate matmuls fused into one block-diagonal matmul
    cat_sc[:, 0:H] = x
    cat_sc[:, H:2 * H] = h
    gates = (jnp.dot(cat_sc[...], gru_wT_ref[...],
                     preferred_element_type=jnp.float32)
             + gru_b_ref[...])                                  # (B, 6H) = [gi | gh]
    i_r, i_z, i_n = gates[:, 0:H], gates[:, H:2 * H], gates[:, 2 * H:3 * H]
    h_r, h_z, h_n = gates[:, 3 * H:4 * H], gates[:, 4 * H:5 * H], gates[:, 5 * H:6 * H]
    r = jax.nn.sigmoid(i_r + h_r)
    z = jax.nn.sigmoid(i_z + h_z)
    n = jnp.tanh(i_n + r * h_n)
    h_new = (1.0 - z) * n + z * h                               # (B, H)
    h_sc[...] = h_new

    # output = log_softmax(out(output), dim=1)
    logits = (jnp.dot(h_new, out_wT_ref[...],
                      preferred_element_type=jnp.float32)
              + out_b_ref[...])                                 # (B, V)
    mm = jnp.max(logits, axis=1, keepdims=True)
    lse = mm + jnp.log(jnp.sum(jnp.exp(logits - mm), axis=1, keepdims=True))
    logp = logits - lse

    # single lane-dense store: [logp (V) | h_new (H) | attn_w (L) | zero pad]
    pad = jnp.zeros((B, packed_ref.shape[2] - V - H - L), jnp.float32)
    packed_ref[0] = jnp.concatenate([logp, h_new, attn_w, pad], axis=1)


def prepare_params(p):
    """One-time packing of PyTorch-layout params into kernel-ready tensors."""
    H = p["embedding"].shape[1]
    z = jnp.zeros((H, 3 * H), jnp.float32)
    gru_wT = jnp.concatenate(                                   # (2H, 6H) block-diagonal
        [jnp.concatenate([p["w_ih"].T, z], axis=1),
         jnp.concatenate([z, p["w_hh"].T], axis=1)], axis=0)
    return {
        "emb":     p["embedding"],                              # (V, H)
        "attn_wT": p["attn_w"].T,    "attn_b": p["attn_b"][None, :],
        "comb_wT": p["combine_w"].T, "comb_b": p["combine_b"][None, :],
        "gru_wT":  gru_wT,
        "gru_b":   jnp.concatenate([p["b_ih"], p["b_hh"]])[None, :],
        "out_wT":  p["out_w"].T,     "out_b":  p["out_b"][None, :],
    }


def _resident(shape):
    n = len(shape)
    return pl.BlockSpec(shape, lambda t, _n=n: (0,) * _n)


@jax.jit
def attn_decoder_decode(tokens, hidden0, encoder_outputs, w):
    """tokens: (T, B) int32; hidden0: (B, H) f32; encoder_outputs: (L, H) f32.
    Runs T AttnDecoderRNN.forward steps (hidden carried) for B independent
    streams inside one Pallas kernel. Returns per-step (logp, hidden, attn_w)."""
    T, B = tokens.shape
    V, H = w["emb"].shape
    L = encoder_outputs.shape[0]
    assert V + H + L <= PACK

    tok3d = tokens.reshape(T, B, 1)

    in_specs = [
        pl.BlockSpec((1, B, 1), lambda t: (t, 0, 0)),       # per-step token ids
        _resident((V, H)),                                  # embedding table
        _resident((B, H)),                                  # initial hidden
        _resident((L, H)),                                  # encoder outputs
        _resident((2 * H, L)), _resident((1, L)),           # attn
        _resident((2 * H, H)), _resident((1, H)),           # attn_combine
        _resident((2 * H, 6 * H)), _resident((1, 6 * H)),   # fused GRU
        _resident((H, V)), _resident((1, V)),               # out
    ]
    out_specs = pl.BlockSpec((1, B, PACK), lambda t: (t, 0, 0))

    packed = pl.pallas_call(
        attn_decoder_kernel,
        out_shape=jax.ShapeDtypeStruct((T, B, PACK), jnp.float32),
        grid_spec=pltpu.PrefetchScalarGridSpec(
            num_scalar_prefetch=0,
            grid=(T,),
            in_specs=in_specs,
            out_specs=out_specs,
            scratch_shapes=[pltpu.VMEM((B, H), jnp.float32),
                            pltpu.VMEM((B, 2 * H), jnp.float32)],
        ),
        compiler_params=pltpu.CompilerParams(
            dimension_semantics=("arbitrary",)),            # hidden carried step->step
    )(tok3d, w["emb"], hidden0, encoder_outputs,
      w["attn_wT"], w["attn_b"], w["comb_wT"], w["comb_b"],
      w["gru_wT"], w["gru_b"], w["out_wT"], w["out_b"])

    logp = packed[:, :, 0:V]
    h_all = packed[:, :, V:V + H]
    attn_w = packed[:, :, V + H:V + H + L]
    return logp, h_all, attn_w


def reference_decode(tokens, hidden0, enc, p):
    """Pure-JAX reference: T sequential AttnDecoderRNN.forward calls (eval mode)."""
    H = p["embedding"].shape[1]

    def step(h, tok):
        embedded = p["embedding"][tok]                               # (B, H)
        cat1 = jnp.concatenate([embedded, h], axis=1)
        aw = jax.nn.softmax(cat1 @ p["attn_w"].T + p["attn_b"], axis=1)
        applied = aw @ enc
        x = jnp.concatenate([embedded, applied], axis=1) @ p["combine_w"].T + p["combine_b"]
        x = jnp.maximum(x, 0.0)
        gi = x @ p["w_ih"].T + p["b_ih"]
        gh = h @ p["w_hh"].T + p["b_hh"]
        r = jax.nn.sigmoid(gi[:, :H] + gh[:, :H])
        z = jax.nn.sigmoid(gi[:, H:2 * H] + gh[:, H:2 * H])
        n = jnp.tanh(gi[:, 2 * H:] + r * gh[:, 2 * H:])
        h_new = (1.0 - z) * n + z * h
        logp = jax.nn.log_softmax(h_new @ p["out_w"].T + p["out_b"], axis=1)
        return h_new, (logp, h_new, aw)

    _, (logps, hs, aws) = jax.lax.scan(step, hidden0, tokens)
    return logps, hs, aws


def init_params(key, hidden_size, output_size, max_length):
    ks = jax.random.split(key, 11)
    s = 0.1
    return {
        "embedding": jax.random.normal(ks[0], (output_size, hidden_size), jnp.float32) * s,
        "attn_w":    jax.random.normal(ks[1], (max_length, 2 * hidden_size), jnp.float32) * s,
        "attn_b":    jax.random.normal(ks[2], (max_length,), jnp.float32) * s,
        "combine_w": jax.random.normal(ks[3], (hidden_size, 2 * hidden_size), jnp.float32) * s,
        "combine_b": jax.random.normal(ks[4], (hidden_size,), jnp.float32) * s,
        "w_ih":      jax.random.normal(ks[5], (3 * hidden_size, hidden_size), jnp.float32) * s,
        "b_ih":      jax.random.normal(ks[6], (3 * hidden_size,), jnp.float32) * s,
        "w_hh":      jax.random.normal(ks[7], (3 * hidden_size, hidden_size), jnp.float32) * s,
        "b_hh":      jax.random.normal(ks[8], (3 * hidden_size,), jnp.float32) * s,
        "out_w":     jax.random.normal(ks[9], (output_size, hidden_size), jnp.float32) * s,
        "out_b":     jax.random.normal(ks[10], (output_size,), jnp.float32) * s,
    }


if __name__ == "__main__":
    key = jax.random.PRNGKey(0)
    kp, kh, ke, kt = jax.random.split(key, 4)

    params = init_params(kp, HIDDEN, VOCAB, MAX_LENGTH)
    weights = prepare_params(params)                              # one-time packing

    tokens = jax.random.randint(kt, (T_STEPS, BATCH), 0, VOCAB, dtype=jnp.int32)
    hidden0 = jax.random.normal(kh, (BATCH, HIDDEN), jnp.float32) * 0.1
    encoder_outputs = jax.random.normal(ke, (MAX_LENGTH, HIDDEN), jnp.float32) * 0.1

    logp, h_all, attn_w = attn_decoder_decode(tokens, hidden0, encoder_outputs, weights)
    jax.block_until_ready((logp, h_all, attn_w))

    r_logp, r_h, r_aw = reference_decode(tokens, hidden0, encoder_outputs, params)
    np.testing.assert_allclose(np.asarray(logp), np.asarray(r_logp), rtol=5e-3, atol=5e-3)
    np.testing.assert_allclose(np.asarray(h_all), np.asarray(r_h), rtol=5e-3, atol=5e-3)
    np.testing.assert_allclose(np.asarray(attn_w), np.asarray(r_aw), rtol=5e-3, atol=5e-3)

    print("KERNEL_OK")
</pallas_src>

<mosaic_0001>
module attributes {stable_mosaic.version = 11 : i64} {
  func.func @attn_decoder_kernel(%arg0: i32, %arg1: memref<1x8x1xi32, #tpu.memory_space<vmem>>, %arg2: memref<64x32xf32, #tpu.memory_space<vmem>>, %arg3: memref<8x32xf32, #tpu.memory_space<vmem>>, %arg4: memref<10x32xf32, #tpu.memory_space<vmem>>, %arg5: memref<64x10xf32, #tpu.memory_space<vmem>>, %arg6: memref<1x10xf32, #tpu.memory_space<vmem>>, %arg7: memref<64x32xf32, #tpu.memory_space<vmem>>, %arg8: memref<1x32xf32, #tpu.memory_space<vmem>>, %arg9: memref<64x192xf32, #tpu.memory_space<vmem>>, %arg10: memref<1x192xf32, #tpu.memory_space<vmem>>, %arg11: memref<32x64xf32, #tpu.memory_space<vmem>>, %arg12: memref<1x64xf32, #tpu.memory_space<vmem>>, %arg13: memref<1x8x128xf32, #tpu.memory_space<vmem>>, %arg14: memref<8x32xf32, #tpu.memory_space<vmem>>, %arg15: memref<8x64xf32, #tpu.memory_space<vmem>>) attributes {dimension_semantics = [#tpu.dimension_semantics<arbitrary>], iteration_bounds = array<i64: 8>, scalar_prefetch = 0 : i64, scratch_operands = 2 : i64, tpu.core_type = #tpu.core_type<tc>, window_params = [{transform_indices = @transform_0, window_bounds = array<i64: 1, 8, 1>}, {pipeline_mode = #tpu.pipeline_mode<synchronous>, transform_indices = @transform_1, window_bounds = array<i64: 64, 32>}, {pipeline_mode = #tpu.pipeline_mode<synchronous>, transform_indices = @transform_2, window_bounds = array<i64: 8, 32>}, {pipeline_mode = #tpu.pipeline_mode<synchronous>, transform_indices = @transform_3, window_bounds = array<i64: 10, 32>}, {pipeline_mode = #tpu.pipeline_mode<synchronous>, transform_indices = @transform_4, window_bounds = array<i64: 64, 10>}, {pipeline_mode = #tpu.pipeline_mode<synchronous>, transform_indices = @transform_5, window_bounds = array<i64: 1, 10>}, {pipeline_mode = #tpu.pipeline_mode<synchronous>, transform_indices = @transform_6, window_bounds = array<i64: 64, 32>}, {pipeline_mode = #tpu.pipeline_mode<synchronous>, transform_indices = @transform_7, window_bounds = array<i64: 1, 32>}, {pipeline_mode = #tpu.pipeline_mode<synchronous>, transform_indices = @transform_8, window_bounds = array<i64: 64, 192>}, {pipeline_mode = #tpu.pipeline_mode<synchronous>, transform_indices = @transform_9, window_bounds = array<i64: 1, 192>}, {pipeline_mode = #tpu.pipeline_mode<synchronous>, transform_indices = @transform_10, window_bounds = array<i64: 32, 64>}, {pipeline_mode = #tpu.pipeline_mode<synchronous>, transform_indices = @transform_11, window_bounds = array<i64: 1, 64>}, {transform_indices = @transform_12, window_bounds = array<i64: 1, 8, 128>}]} {
    %c0_i32 = arith.constant 0 : i32
    %0 = arith.cmpi eq, %arg0, %c0_i32 : i32
    %1 = arith.extui %0 : i1 to i32
    %c0_i32_0 = arith.constant 0 : i32
    %2 = arith.cmpi ne, %1, %c0_i32_0 : i32
    scf.if %2 {
      %c0_61 = arith.constant 0 : index
      %c0_62 = arith.constant 0 : index
      %99 = vector.load %arg3[%c0_61, %c0_62] : memref<8x32xf32, #tpu.memory_space<vmem>>, vector<8x32xf32>
      %c0_63 = arith.constant 0 : index
      %c0_64 = arith.constant 0 : index
      %100 = vector.load %arg14[%c0_63, %c0_64] : memref<8x32xf32, #tpu.memory_space<vmem>>, vector<8x32xf32>
      tpu.vector_store %arg14[%c0_63, %c0_64], %99 {strides = array<i32>} : memref<8x32xf32, #tpu.memory_space<vmem>>, vector<8x32xf32>,
    } else {
    }
    %c0 = arith.constant 0 : index
    %c0_1 = arith.constant 0 : index
    %3 = vector.load %arg14[%c0, %c0_1] : memref<8x32xf32, #tpu.memory_space<vmem>>, vector<8x32xf32>
    %c0_2 = arith.constant 0 : index
    %c0_3 = arith.constant 0 : index
    %c0_4 = arith.constant 0 : index
    %4 = vector.load %arg1[%c0_2, %c0_3, %c0_4] : memref<1x8x1xi32, #tpu.memory_space<vmem>>, vector<1x8x1xi32>
    %5 = vector.shape_cast %4 : vector<1x8x1xi32> to vector<8x1xi32>
    %6 = tpu.iota {dimensions = array<i32: 1>} : vector<8x64xi32>
    %7 = vector.broadcast %5 : vector<8x1xi32> to vector<8x64xi32>
    %8 = arith.cmpi eq, %7, %6 : vector<8x64xi32>
    %cst = arith.constant 1.000000e+00 : f32
    %cst_5 = arith.constant 0.000000e+00 : f32
    %9 = vector.broadcast %cst : f32 to vector<8x64xf32>
    %10 = vector.broadcast %cst_5 : f32 to vector<8x64xf32>
    %11 = arith.select %8, %9, %10 : vector<8x64xi1>, vector<8x64xf32>
    %c0_6 = arith.constant 0 : index
    %c0_7 = arith.constant 0 : index
    %12 = vector.load %arg2[%c0_6, %c0_7] : memref<64x32xf32, #tpu.memory_space<vmem>>, vector<64x32xf32>
    %cst_8 = arith.constant dense<0.000000e+00> : vector<8x32xf32>
    %13 = tpu.matmul %11, %12, %cst_8 {dimension_numbers = #tpu.dot_dimension_numbers<[1], [0], [0], [1], [0, 0, 1, 1], [], []>} : vector<8x64xf32>, vector<64x32xf32>, vector<8x32xf32> -> vector<8x32xf32>
    %c0_9 = arith.constant 0 : index
    %c0_10 = arith.constant 0 : index
    %14 = vector.load %arg15[%c0_9, %c0_10] : memref<8x64xf32, #tpu.memory_space<vmem>>, vector<8x32xf32>
    tpu.vector_store %arg15[%c0_9, %c0_10], %13 {strides = array<i32>} : memref<8x64xf32, #tpu.memory_space<vmem>>, vector<8x32xf32>,
    %c0_11 = arith.constant 0 : index
    %c32 = arith.constant 32 : index
    %15 = vector.load %arg15[%c0_11, %c32] : memref<8x64xf32, #tpu.memory_space<vmem>>, vector<8x32xf32>
    tpu.vector_store %arg15[%c0_11, %c32], %3 {strides = array<i32>} : memref<8x64xf32, #tpu.memory_space<vmem>>, vector<8x32xf32>,
    %c0_12 = arith.constant 0 : index
    %c0_13 = arith.constant 0 : index
    %16 = vector.load %arg15[%c0_12, %c0_13] : memref<8x64xf32, #tpu.memory_space<vmem>>, vector<8x64xf32>
    %c0_14 = arith.constant 0 : index
    %c0_15 = arith.constant 0 : index
    %17 = vector.load %arg5[%c0_14, %c0_15] : memref<64x10xf32, #tpu.memory_space<vmem>>, vector<64x10xf32>
    %cst_16 = arith.constant dense<0.000000e+00> : vector<8x10xf32>
    %18 = tpu.matmul %16, %17, %cst_16 {dimension_numbers = #tpu.dot_dimension_numbers<[1], [0], [0], [1], [0, 0, 1, 1], [], []>} : vector<8x64xf32>, vector<64x10xf32>, vector<8x10xf32> -> vector<8x10xf32>
    %c0_17 = arith.constant 0 : index
    %c0_18 = arith.constant 0 : index
    %19 = vector.load %arg6[%c0_17, %c0_18] : memref<1x10xf32, #tpu.memory_space<vmem>>, vector<1x10xf32>
    %20 = vector.broadcast %19 : vector<1x10xf32> to vector<8x10xf32>
    %21 = arith.addf %18, %20 : vector<8x10xf32>
    %cst_19 = arith.constant dense<0xFF800000> : vector<8xf32>
    %22 = vector.multi_reduction <maximumf>, %21, %cst_19 [1] : vector<8x10xf32> to vector<8xf32>
    %23 = vector.shape_cast %22 : vector<8xf32> to vector<8x1xf32>
    %24 = vector.broadcast %23 : vector<8x1xf32> to vector<8x10xf32>
    %25 = arith.subf %21, %24 : vector<8x10xf32>
    %26 = math.exp %25 : vector<8x10xf32>
    %cst_20 = arith.constant dense<0.000000e+00> : vector<8xf32>
    %27 = vector.multi_reduction <add>, %26, %cst_20 [1] : vector<8x10xf32> to vector<8xf32>
    %28 = vector.shape_cast %27 : vector<8xf32> to vector<8x1xf32>
    %29 = tpu.reciprocal %28 {approx = true} : vector<8x1xf32> -> vector<8x1xf32>
    %30 = vector.broadcast %29 : vector<8x1xf32> to vector<8x10xf32>
    %31 = arith.mulf %26, %30 : vector<8x10xf32>
    %c0_21 = arith.constant 0 : index
    %c0_22 = arith.constant 0 : index
    %32 = vector.load %arg4[%c0_21, %c0_22] : memref<10x32xf32, #tpu.memory_space<vmem>>, vector<10x32xf32>
    %cst_23 = arith.constant dense<0.000000e+00> : vector<8x32xf32>
    %33 = tpu.matmul %31, %32, %cst_23 {dimension_numbers = #tpu.dot_dimension_numbers<[1], [0], [0], [1], [0, 0, 1, 1], [], []>} : vector<8x10xf32>, vector<10x32xf32>, vector<8x32xf32> -> vector<8x32xf32>
    %c0_24 = arith.constant 0 : index
    %c32_25 = arith.constant 32 : index
    %34 = vector.load %arg15[%c0_24, %c32_25] : memref<8x64xf32, #tpu.memory_space<vmem>>, vector<8x32xf32>
    tpu.vector_store %arg15[%c0_24, %c32_25], %33 {strides = array<i32>} : memref<8x64xf32, #tpu.memory_space<vmem>>, vector<8x32xf32>,
    %c0_26 = arith.constant 0 : index
    %c0_27 = arith.constant 0 : index
    %35 = vector.load %arg15[%c0_26, %c0_27] : memref<8x64xf32, #tpu.memory_space<vmem>>, vector<8x64xf32>
    %c0_28 = arith.constant 0 : index
    %c0_29 = arith.constant 0 : index
    %36 = vector.load %arg7[%c0_28, %c0_29] : memref<64x32xf32, #tpu.memory_space<vmem>>, vector<64x32xf32>
    %cst_30 = arith.constant dense<0.000000e+00> : vector<8x32xf32>
    %37 = tpu.matmul %35, %36, %cst_30 {dimension_numbers = #tpu.dot_dimension_numbers<[1], [0], [0], [1], [0, 0, 1, 1], [], []>} : vector<8x64xf32>, vector<64x32xf32>, vector<8x32xf32> -> vector<8x32xf32>
    %c0_31 = arith.constant 0 : index
    %c0_32 = arith.constant 0 : index
    %38 = vector.load %arg8[%c0_31, %c0_32] : memref<1x32xf32, #tpu.memory_space<vmem>>, vector<1x32xf32>
    %39 = vector.broadcast %38 : vector<1x32xf32> to vector<8x32xf32>
    %40 = arith.addf %37, %39 : vector<8x32xf32>
    %cst_33 = arith.constant 0.000000e+00 : f32
    %41 = vector.broadcast %cst_33 : f32 to vector<8x32xf32>
    %42 = arith.maximumf %40, %41 : vector<8x32xf32>
    %c0_34 = arith.constant 0 : index
    %c0_35 = arith.constant 0 : index
    %43 = vector.load %arg15[%c0_34, %c0_35] : memref<8x64xf32, #tpu.memory_space<vmem>>, vector<8x32xf32>
    tpu.vector_store %arg15[%c0_34, %c0_35], %42 {strides = array<i32>} : memref<8x64xf32, #tpu.memory_space<vmem>>, vector<8x32xf32>,
    %c0_36 = arith.constant 0 : index
    %c32_37 = arith.constant 32 : index
    %44 = vector.load %arg15[%c0_36, %c32_37] : memref<8x64xf32, #tpu.memory_space<vmem>>, vector<8x32xf32>
    tpu.vector_store %arg15[%c0_36, %c32_37], %3 {strides = array<i32>} : memref<8x64xf32, #tpu.memory_space<vmem>>, vector<8x32xf32>,
    %c0_38 = arith.constant 0 : index
    %c0_39 = arith.constant 0 : index
    %45 = vector.load %arg15[%c0_38, %c0_39] : memref<8x64xf32, #tpu.memory_space<vmem>>, vector<8x64xf32>
    %c0_40 = arith.constant 0 : index
    %c0_41 = arith.constant 0 : index
    %46 = vector.load %arg9[%c0_40, %c0_41] : memref<64x192xf32, #tpu.memory_space<vmem>>, vector<64x192xf32>
    %cst_42 = arith.constant dense<0.000000e+00> : vector<8x192xf32>
    %47 = tpu.matmul %45, %46, %cst_42 {dimension_numbers = #tpu.dot_dimension_numbers<[1], [0], [0], [1], [0, 0, 1, 1], [], []>} : vector<8x64xf32>, vector<64x192xf32>, vector<8x192xf32> -> vector<8x192xf32>
    %c0_43 = arith.constant 0 : index
    %c0_44 = arith.constant 0 : index
    %48 = vector.load %arg10[%c0_43, %c0_44] : memref<1x192xf32, #tpu.memory_space<vmem>>, vector<1x192xf32>
    %49 = vector.broadcast %48 : vector<1x192xf32> to vector<8x192xf32>
    %50 = arith.addf %47, %49 : vector<8x192xf32>
    %51 = vector.extract_strided_slice %50 {offsets = [0, 0], sizes = [8, 32], strides = [1, 1]} : vector<8x192xf32> to vector<8x32xf32>
    %52 = vector.extract_strided_slice %50 {offsets = [0, 32], sizes = [8, 32], strides = [1, 1]} : vector<8x192xf32> to vector<8x32xf32>
    %53 = vector.extract_strided_slice %50 {offsets = [0, 64], sizes = [8, 32], strides = [1, 1]} : vector<8x192xf32> to vector<8x32xf32>
    %54 = vector.extract_strided_slice %50 {offsets = [0, 96], sizes = [8, 32], strides = [1, 1]} : vector<8x192xf32> to vector<8x32xf32>
    %55 = vector.extract_strided_slice %50 {offsets = [0, 128], sizes = [8, 32], strides = [1, 1]} : vector<8x192xf32> to vector<8x32xf32>
    %56 = vector.extract_strided_slice %50 {offsets = [0, 160], sizes = [8, 32], strides = [1, 1]} : vector<8x192xf32> to vector<8x32xf32>
    %57 = arith.addf %51, %54 : vector<8x32xf32>
    %58 = arith.negf %57 : vector<8x32xf32>
    %59 = math.exp %58 : vector<8x32xf32>
    %cst_45 = arith.constant 1.000000e+00 : f32
    %60 = vector.broadcast %cst_45 : f32 to vector<8x32xf32>
    %61 = arith.addf %60, %59 : vector<8x32xf32>
    %62 = arith.divf %60, %61 : vector<8x32xf32>
    %63 = arith.addf %52, %55 : vector<8x32xf32>
    %64 = arith.negf %63 : vector<8x32xf32>
    %65 = math.exp %64 : vector<8x32xf32>
    %cst_46 = arith.constant 1.000000e+00 : f32
    %66 = vector.broadcast %cst_46 : f32 to vector<8x32xf32>
    %67 = arith.addf %66, %65 : vector<8x32xf32>
    %68 = arith.divf %66, %67 : vector<8x32xf32>
    %69 = arith.mulf %62, %56 : vector<8x32xf32>
    %70 = arith.addf %53, %69 : vector<8x32xf32>
    %71 = math.tanh %70 : vector<8x32xf32>
    %cst_47 = arith.constant 1.000000e+00 : f32
    %72 = vector.broadcast %cst_47 : f32 to vector<8x32xf32>
    %73 = arith.subf %72, %68 : vector<8x32xf32>
    %74 = arith.mulf %73, %71 : vector<8x32xf32>
    %75 = arith.mulf %68, %3 : vector<8x32xf32>
    %76 = arith.addf %74, %75 : vector<8x32xf32>
    %c0_48 = arith.constant 0 : index
    %c0_49 = arith.constant 0 : index
    %77 = vector.load %arg14[%c0_48, %c0_49] : memref<8x32xf32, #tpu.memory_space<vmem>>, vector<8x32xf32>
    tpu.vector_store %arg14[%c0_48, %c0_49], %76 {strides = array<i32>} : memref<8x32xf32, #tpu.memory_space<vmem>>, vector<8x32xf32>,
    %c0_50 = arith.constant 0 : index
    %c0_51 = arith.constant 0 : index
    %78 = vector.load %arg11[%c0_50, %c0_51] : memref<32x64xf32, #tpu.memory_space<vmem>>, vector<32x64xf32>
    %cst_52 = arith.constant dense<0.000000e+00> : vector<8x64xf32>
    %79 = tpu.matmul %76, %78, %cst_52 {dimension_numbers = #tpu.dot_dimension_numbers<[1], [0], [0], [1], [0, 0, 1, 1], [], []>} : vector<8x32xf32>, vector<32x64xf32>, vector<8x64xf32> -> vector<8x64xf32>
    %c0_53 = arith.constant 0 : index
    %c0_54 = arith.constant 0 : index
    %80 = vector.load %arg12[%c0_53, %c0_54] : memref<1x64xf32, #tpu.memory_space<vmem>>, vector<1x64xf32>
    %81 = vector.broadcast %80 : vector<1x64xf32> to vector<8x64xf32>
    %82 = arith.addf %79, %81 : vector<8x64xf32>
    %cst_55 = arith.constant dense<0xFF800000> : vector<8xf32>
    %83 = vector.multi_reduction <maximumf>, %82, %cst_55 [1] : vector<8x64xf32> to vector<8xf32>
    %84 = vector.shape_cast %83 : vector<8xf32> to vector<8x1xf32>
    %85 = vector.broadcast %84 : vector<8x1xf32> to vector<8x64xf32>
    %86 = arith.subf %82, %85 : vector<8x64xf32>
    %87 = math.exp %86 : vector<8x64xf32>
    %cst_56 = arith.constant dense<0.000000e+00> : vector<8xf32>
    %88 = vector.multi_reduction <add>, %87, %cst_56 [1] : vector<8x64xf32> to vector<8xf32>
    %89 = vector.shape_cast %88 : vector<8xf32> to vector<8x1xf32>
    %90 = math.log %89 : vector<8x1xf32>
    %91 = arith.addf %84, %90 : vector<8x1xf32>
    %92 = vector.broadcast %91 : vector<8x1xf32> to vector<8x64xf32>
    %93 = arith.subf %82, %92 : vector<8x64xf32>
    %cst_57 = arith.constant 0.000000e+00 : f32
    %94 = vector.broadcast %cst_57 : f32 to vector<8x22xf32>
    %95 = tpu.concatenate %93, %76, %31, %94 in 1 : vector<8x64xf32>, vector<8x32xf32>, vector<8x10xf32>, vector<8x22xf32> -> vector<8x128xf32>
    %c0_58 = arith.constant 0 : index
    %c0_59 = arith.constant 0 : index
    %c0_60 = arith.constant 0 : index
    %96 = vector.load %arg13[%c0_58, %c0_59, %c0_60] : memref<1x8x128xf32, #tpu.memory_space<vmem>>, vector<1x8x128xf32>
    %97 = vector.shape_cast %96 : vector<1x8x128xf32> to vector<8x128xf32>
    %98 = vector.shape_cast %95 : vector<8x128xf32> to vector<1x8x128xf32>
    tpu.vector_store %arg13[%c0_58, %c0_59, %c0_60], %98 {strides = array<i32>} : memref<1x8x128xf32, #tpu.memory_space<vmem>>, vector<1x8x128xf32>,
    return
  }
  func.func @transform_0(%arg0: i32) -> (i32, i32, i32) {
    %c0_i32 = arith.constant 0 : i32
    %c0_i32_0 = arith.constant 0 : i32
    %c0_i32_1 = arith.constant 0 : i32
    return %arg0, %c0_i32, %c0_i32_0 : i32, i32, i32
  }
  func.func @transform_1(%arg0: i32) -> (i32, i32) {
    %c0_i32 = arith.constant 0 : i32
    %c0_i32_0 = arith.constant 0 : i32
    %c0_i32_1 = arith.constant 0 : i32
    return %c0_i32, %c0_i32_0 : i32, i32
  }
  func.func @transform_2(%arg0: i32) -> (i32, i32) {
    %c0_i32 = arith.constant 0 : i32
    %c0_i32_0 = arith.constant 0 : i32
    %c0_i32_1 = arith.constant 0 : i32
    return %c0_i32, %c0_i32_0 : i32, i32
  }
  func.func @transform_3(%arg0: i32) -> (i32, i32) {
    %c0_i32 = arith.constant 0 : i32
    %c0_i32_0 = arith.constant 0 : i32
    %c0_i32_1 = arith.constant 0 : i32
    return %c0_i32, %c0_i32_0 : i32, i32
  }
  func.func @transform_4(%arg0: i32) -> (i32, i32) {
    %c0_i32 = arith.constant 0 : i32
    %c0_i32_0 = arith.constant 0 : i32
    %c0_i32_1 = arith.constant 0 : i32
    return %c0_i32, %c0_i32_0 : i32, i32
  }
  func.func @transform_5(%arg0: i32) -> (i32, i32) {
    %c0_i32 = arith.constant 0 : i32
    %c0_i32_0 = arith.constant 0 : i32
    %c0_i32_1 = arith.constant 0 : i32
    return %c0_i32, %c0_i32_0 : i32, i32
  }
  func.func @transform_6(%arg0: i32) -> (i32, i32) {
    %c0_i32 = arith.constant 0 : i32
    %c0_i32_0 = arith.constant 0 : i32
    %c0_i32_1 = arith.constant 0 : i32
    return %c0_i32, %c0_i32_0 : i32, i32
  }
  func.func @transform_7(%arg0: i32) -> (i32, i32) {
    %c0_i32 = arith.constant 0 : i32
    %c0_i32_0 = arith.constant 0 : i32
    %c0_i32_1 = arith.constant 0 : i32
    return %c0_i32, %c0_i32_0 : i32, i32
  }
  func.func @transform_8(%arg0: i32) -> (i32, i32) {
    %c0_i32 = arith.constant 0 : i32
    %c0_i32_0 = arith.constant 0 : i32
    %c0_i32_1 = arith.constant 0 : i32
    return %c0_i32, %c0_i32_0 : i32, i32
  }
  func.func @transform_9(%arg0: i32) -> (i32, i32) {
    %c0_i32 = arith.constant 0 : i32
    %c0_i32_0 = arith.constant 0 : i32
    %c0_i32_1 = arith.constant 0 : i32
    return %c0_i32, %c0_i32_0 : i32, i32
  }
  func.func @transform_10(%arg0: i32) -> (i32, i32) {
    %c0_i32 = arith.constant 0 : i32
    %c0_i32_0 = arith.constant 0 : i32
    %c0_i32_1 = arith.constant 0 : i32
    return %c0_i32, %c0_i32_0 : i32, i32
  }
  func.func @transform_11(%arg0: i32) -> (i32, i32) {
    %c0_i32 = arith.constant 0 : i32
    %c0_i32_0 = arith.constant 0 : i32
    %c0_i32_1 = arith.constant 0 : i32
    return %c0_i32, %c0_i32_0 : i32, i32
  }
  func.func @transform_12(%arg0: i32) -> (i32, i32, i32) {
    %c0_i32 = arith.constant 0 : i32
    %c0_i32_0 = arith.constant 0 : i32
    %c0_i32_1 = arith.constant 0 : i32
    return %arg0, %c0_i32, %c0_i32_0 : i32, i32, i32
  }
}

</mosaic_0001>

<bundles_post_ra>
// kernel: attn_decoder_decode.1
= control target key start
LH: loop header
LB: loop body
LE: loop exit
PB: predicated region body
PF: predicated region fallthrough
CT: control target
= control target key end

     0   :  { %s1345_s21 = smov 0   ;;  %s1597_s0 = inlined_call_operand.vmem [shape: s32[8,8,1], index: 0, kind: input, shape index: {}]   ;;  %s1598_s1 = inlined_call_operand.vmem [shape: f32[64,32], index: 1, kind: input, shape index: {}]   ;;  %s1599_s2 = inlined_call_operand.vmem [shape: f32[8,32], index: 2, kind: input, shape index: {}]   ;;  %s1600_s3 = inlined_call_operand.vmem [shape: f32[10,32], index: 3, kind: input, shape index: {}]   ;;  %s1601_s4 = inlined_call_operand.vmem [shape: f32[64,10], index: 4, kind: input, shape index: {}]   ;;  %s1602_s5 = inlined_call_operand.vmem [shape: f32[1,10], index: 5, kind: input, shape index: {}]   ;;  %s1603_s6 = inlined_call_operand.vmem [shape: f32[64,32], index: 6, kind: input, shape index: {}]   ;;  %s1604_s7 = inlined_call_operand.vmem [shape: f32[1,32], index: 7, kind: input, shape index: {}]   ;;  %s1605_s8 = inlined_call_operand.vmem [shape: f32[64,192], index: 8, kind: input, shape index: {}]   ;;  %s1606_s9 = inlined_call_operand.vmem [shape: f32[1,192], index: 9, kind: input, shape index: {}]   ;;  %s1607_s10 = inlined_call_operand.vmem [shape: f32[32,64], index: 10, kind: input, shape index: {}]   ;;  %s1608_s11 = inlined_call_operand.vmem [shape: f32[1,64], index: 11, kind: input, shape index: {}]   ;;  %s1609_s12 = inlined_call_operand.vmem [shape: f32[8,8,128], index: 12, kind: output, shape index: {}]  }
   0x1 LB: > { %s1101_s22 = sadd.s32 4294967295, %s1272_s21   ;;  %p1105_p0 = scmp.ge.s32.totalorder %s1272_s21, 1  ;;  %s1272_s21 = sphi %s1345_s21, %s22_s21  }
   0x2   : > { %p361_p1 = scmp.lt.s32.totalorder %s1272_s21, 9 }
   0x4   : > { %p362_p2 = pnand %p1105_p0, %p361_p1 }
   0x5   : > { %p401_p3 = scmp.lt.s32.totalorder (!%p362_p2), %s1101_s22, 7  ;;  %p1108_p4 = scmp.ne.s32.totalorder (!%p362_p2), %s1101_s22, 0 }
   0x6   : > { %365 = sbr.rel (%p362_p2) target bundleno = 2604 (0xa2c), region = 68 }
   0xb   : > { %s402_s23 = scalar_select %p401_p3, %s1101_s22, 7 }
   0xc   : > { %412 = sbr.rel (%p1108_p4) target bundleno = 19 (0x13), region = 72 }
   0xd   : > { %s1106_s24 = sshll.u32 %s402_s23, 3 }
   0xe   : > { %s404_s27 = scalar_lea.vmem %s1597_s0, %s1106_s24  ;;  %s1359_s30 = scalar_lea.vmem %s1609_s12, %s1106_s24 }
  0x11   : > { %v413_v0 = vld [vmem:[%s1599_s2] sm:$0xff]  ;;  %vm414_vm0 = vcmask 261120  }
  0x12   : > { %415 = vst.msk [vmem:[#allocation2] sm:$0xff] %vm414_vm0, %v413_v0 }
  0x13 PF: > { %v417_v1 = vld [vmem:[%s404_s27] sm:$0xff]  ;;  %v432_v2 = vld [vmem:[%s1598_s1 + $0x38] sm:$0xff]  ;;  %v1274_v3 = vmov 0   ;;  %v1275_v4 = vmov 0.0   ;;  %v431_v5 = vld [vmem:[%s1598_s1 + $0x30] sm:$0xff]  ;;  %vm1276_vm1 = vmmov 0   ;;  %v418_v16 = vlaneseq }
  0x14   : > { %1247 = vset.pattern.permute.xlu0 %v1274_v3  ;;  %1158 = vmatprep.subr.mxu0 %v1275_v4  ;;  %v430_v6 = vld [vmem:[%s1598_s1 + $0x28] sm:$0xff]  ;;  %v523_v8 = vld [vmem:[%s1601_s4 + $0x38] sm:$0xff]  ;;  %v429_v9 = vld [vmem:[%s1598_s1 + $0x20] sm:$0xff]  ;;  %s1277_s28 = smov 32   ;;  %vm433_vm2 = vcmask 523264   ;;  %vm507_vm4 = vcmask 261120  }
  0x15   : > { %421 = vperm.xlu0 %1247, %v417_v1   ;;  %1159 = vmatpush3.msra.mxu0 %v432_v2  ;;  %v522_v10 = vld [vmem:[%s1601_s4 + $0x30] sm:$0xff]  ;;  %v428_v11 = vld [vmem:[%s1598_s1 + $0x18] sm:$0xff]  ;;  %v521_v12 = vld [vmem:[%s1601_s4 + $0x28] sm:$0xff]  ;;  %v419_v17 = vand.u32 127, %v418_v16  ;;  %vm513_vm5 = vcmask 523520   ;;  %vm604_vm6 = vcmask 80896  }
  0x16   : > { %1160 = vmatprep.subr.mxu0 %v1275_v4  ;;  %1174 = vmatprep.mubr.msk.f32.mxu0 %vm1276_vm1, %v1275_v4  ;;  %v427_v13 = vld [vmem:[%s1598_s1 + $0x10] sm:$0xff]  ;;  %v426_v14 = vld [vmem:[%s1598_s1 + $0x8] sm:$0xff]  ;;  %v425_v15 = vld [vmem:[%s1598_s1] sm:$0xff]  ;;  %vm621_vm7 = vcmask 1041408   ;;  %s1278_s15 = smov 96   ;;  %s1279_s16 = smov 64  }
  0x17   : > { %1161 = vmatpush3.msra.mxu0 %v431_v5  ;;  %1177 = vmatprep.subr.mxu1 %v1275_v4  ;;  %v520_v20 = vld [vmem:[%s1601_s4 + $0x20] sm:$0xff]  ;;  %v519_v21 = vld [vmem:[%s1601_s4 + $0x18] sm:$0xff]  ;;  %v518_v22 = vld [vmem:[%s1601_s4 + $0x10] sm:$0xff]  ;;  %vm1043_vm8 = vcmask 785408   ;;  %vm1045_vm9 = vcmask 867328  }
  0x18   : > { %1162 = vmatprep.subr.mxu0 %v1275_v4  ;;  %1178 = vmatpush3.msra.mxu1 %v523_v8  ;;  %v517_v23 = vld [vmem:[%s1601_s4 + $0x8] sm:$0xff]  ;;  %v516_v24 = vld [vmem:[%s1601_s4] sm:$0xff]  ;;  %v708_v44 = vld [vmem:[%s1603_s6 + $0x38] sm:$0xff] }
  0x19   : > { %v416_v7 = vld [vmem:[#allocation2] sm:$0xff]  ;;  %1163 = vmatpush3.msra.mxu0 %v430_v6  ;;  %1179 = vmatprep.subr.mxu1 %v1275_v4  ;;  %v617_v39 = vld [vmem:[%s1600_s3 + $0x8] sm:$0x3]  ;;  %v707_v45 = vld [vmem:[%s1603_s6 + $0x30] sm:$0xff] }
  0x1a   : > { %510 = vrot.lane.b32.xlu0 %v416_v7, %s1277_s28  ;;  %1164 = vmatprep.subr.mxu0 %v1275_v4  ;;  %v1110_v29 = vld [vmem:[%s1602_s5] ss:$0 sm:$0xff]  ;;  %v706_v46 = vld [vmem:[%s1603_s6 + $0x28] sm:$0xff]  ;;  %v704_v48 = vld [vmem:[%s1603_s6 + $0x18] sm:$0xff] }
  0x1b   : > { %1165 = vmatpush3.msra.mxu0 %v429_v9  ;;  %1180 = vmatpush3.msra.mxu1 %v522_v10  ;;  %v616_v40 = vld [vmem:[%s1600_s3] sm:$0xff]  ;;  %v703_v49 = vld [vmem:[%s1603_s6 + $0x10] sm:$0xff]  ;;  %v702_v50 = vld [vmem:[%s1603_s6 + $0x8] sm:$0xff] }
  0x1c   : > { %1166 = vmatprep.subr.mxu0 %v1275_v4  ;;  %1181 = vmatprep.subr.mxu1 %v1275_v4  ;;  %v705_v47 = vld [vmem:[%s1603_s6 + $0x20] sm:$0xff]  ;;  %v808_v52 = vld [vmem:[%s1605_s8 + $0x78] sm:$0xff]  ;;  %v807_v53 = vld [vmem:[%s1605_s8 + $0x70] sm:$0xff] }
  0x1d   : > { %1167 = vmatpush3.msra.mxu0 %v428_v11  ;;  %1182 = vmatpush3.msra.mxu1 %v521_v12  ;;  %v701_v51 = vld [vmem:[%s1603_s6] sm:$0xff]  ;;  %v806_v58 = vld [vmem:[%s1605_s8 + $0x68] sm:$0xff]  ;;  %v804_v60 = vld [vmem:[%s1605_s8 + $0x58] sm:$0xff] }
  0x1e   : > { %1168 = vmatprep.subr.mxu0 %v1275_v4  ;;  %1183 = vmatprep.subr.mxu1 %v1275_v4  ;;  %v805_v59 = vld [vmem:[%s1605_s8 + $0x60] sm:$0xff]  ;;  %v803_v61 = vld [vmem:[%s1605_s8 + $0x50] sm:$0xff]  ;;  %v802_v62 = vld [vmem:[%s1605_s8 + $0x48] sm:$0xff] }
  0x1f   : > { %1169 = vmatpush3.msra.mxu0 %v427_v13  ;;  %1193 = vmatprep.mubr.msk.f32.mxu1 %vm1276_vm1, %v1275_v4  ;;  %v801_v63 = vld [vmem:[%s1605_s8 + $0x40] sm:$0xff]  ;;  %v800_v0 = vld [vmem:[%s1605_s8 + $0x38] sm:$0xff]  ;;  %v799_v1 = vld [vmem:[%s1605_s8 + $0x30] sm:$0xff] }
  0x20   : > { %1170 = vmatprep.subr.mxu0 %v1275_v4  ;;  %1184 = vmatpush3.msra.mxu1 %v520_v20  ;;  %v798_v2 = vld [vmem:[%s1605_s8 + $0x28] sm:$0xff]  ;;  %v797_v3 = vld [vmem:[%s1605_s8 + $0x20] sm:$0xff]  ;;  %v796_v5 = vld [vmem:[%s1605_s8 + $0x18] sm:$0xff] }
  0x21   : > { %1171 = vmatpush3.msra.mxu0 %v426_v14  ;;  %1185 = vmatprep.subr.mxu1 %v1275_v4  ;;  %v795_v6 = vld [vmem:[%s1605_s8 + $0x10] sm:$0xff]  ;;  %v794_v7 = vld [vmem:[%s1605_s8 + $0x8] sm:$0xff]  ;;  %v793_v8 = vld [vmem:[%s1605_s8] sm:$0xff] }
  0x22   : > { %1172 = vmatprep.subr.mxu0 %v1275_v4  ;;  %1186 = vmatpush3.msra.mxu1 %v519_v21  ;;  %v1114_v9 = vld [vmem:[%s1604_s7] ss:$0 sm:$0xff] }
  0x23   : > { %1173 = vmatpush3.msra.mxu0 %v425_v15  ;;  %1187 = vmatprep.subr.mxu1 %v1275_v4  ;;  %v812_v15 = vshrl.u32 %v418_v16, 7 }
  0x24   : > { %1196 = vmatprep.subr.mxu0 %v1275_v4  ;;  %1188 = vmatpush3.msra.mxu1 %v518_v22 }
  0x25   : > { %1189 = vmatprep.subr.mxu1 %v1275_v4 }
  0x26   : > { %1190 = vmatpush3.msra.mxu1 %v517_v23 }
  0x27   : > { %1191 = vmatprep.subr.mxu1 %v1275_v4 }
  0x28   : > { %1192 = vmatpush3.msra.mxu1 %v516_v24 }
  0x29   : > { %1203 = vmatprep.subr.mxu1 %v1275_v4 }
  0x90   : > { %v422_v18 = vpop.permute.xlu0 %421 }
  0x91   : > { %vm423_vm3 = vcmp.eq.s32.totalorder %v422_v18, %v419_v17  ;;  %v813_v17 = vsub.s32 0, %v812_v15  ;;  %v809_v18 = vld [vmem:[%s1606_s9] sm:$0x3] }
  0x92   : > { %v424_v19 = vsel %vm423_vm3, 1.0, %v1275_v4 }
  0x93   : > { %1175 = vmatmul.mubr.msk.f32.vlgmr.msra.gmra.mxu0 %vm433_vm2, %v424_v19  ;;  %v817_v19 = vsub.s32 1, %v812_v15  ;;  %v814_v20 = vrot.slane %v809_v18, %v813_v17 }
  0x94   : > { %1200 = vmatprep.mubr.msk.f32.mxu0 %vm1276_vm1, %v1275_v4  ;;  %v1440_v25 = vpop.permute.xlu0 %510  ;;  %1197 = vmatpush3.msk.msra.mxu0 %vm621_vm7, %v617_v39  ;;  %v940_v39 = vld [vmem:[%s1607_s10] sm:$0xff] }
  0x95   : > { %1198 = vmatprep.subr.mxu0 %v1275_v4  ;;  %v818_v21 = vrot.slane %v809_v18, %v817_v19 }
  0x96   : > { %1199 = vmatpush3.msra.mxu0 %v616_v40 }
  0x97   : > { %840 = vmatprep.subr.mxu0 %v808_v52 }
 0x153   : > { %v503_v26 = vpop.f32.mrf.mxu0 }
 0x154   : > { %508 = vst.msk [vmem:[#allocation3] sm:$0xff] %vm507_vm4, %v503_v26 }
 0x155   : > { %514 = vst.msk [vmem:[#allocation3] sm:$0xff] %vm513_vm5, %v1440_v25  ;;  %v1176_v27 = vpop.f32.mrf.mxu0 }
 0x15c   : > { %v515_v28 = vld [vmem:[#allocation3] sm:$0xff] }
 0x15d   : > { %1194 = vmatmul.mubr.msk.f32.vlgmr.msra.gmra.mxu1 %vm433_vm2, %v515_v28 }
 0x15e   : > { %1219 = vmatprep.mubr.msk.f32.mxu1 %vm1276_vm1, %v1275_v4  ;;  %1204 = vmatpush3.msra.mxu1 %v708_v44 }
 0x15f   : > { %1205 = vmatprep.subr.mxu1 %v1275_v4 }
 0x160   : > { %1206 = vmatpush3.msra.mxu1 %v707_v45 }
 0x161   : > { %1207 = vmatprep.subr.mxu1 %v1275_v4 }
 0x162   : > { %1208 = vmatpush3.msra.mxu1 %v706_v46 }
 0x163   : > { %1209 = vmatprep.subr.mxu1 %v1275_v4 }
 0x164   : > { %1210 = vmatpush3.msra.mxu1 %v705_v47 }
 0x165   : > { %1211 = vmatprep.subr.mxu1 %v1275_v4 }
 0x166   : > { %1212 = vmatpush3.msra.mxu1 %v704_v48 }
 0x167   : > { %1213 = vmatprep.subr.mxu1 %v1275_v4 }
 0x168   : > { %1214 = vmatpush3.msra.mxu1 %v703_v49 }
 0x169   : > { %1215 = vmatprep.subr.mxu1 %v1275_v4 }
 0x16a   : > { %1216 = vmatpush3.msra.mxu1 %v702_v50 }
 0x16b   : > { %1217 = vmatprep.subr.mxu1 %v1275_v4 }
 0x16c   : > { %1218 = vmatpush3.msra.mxu1 %v701_v51 }
 0x16d   : > { %1222 = vmatprep.subr.mxu1 %v1275_v4 }
 0x21d   : > { %v600_v30 = vpop.f32.mrf.mxu1 }
 0x21e   : > { %v601_v31 = vadd.f32 %v1110_v29, %v600_v30 }
 0x21f   : > { %v1195_v32 = vpop.f32.mrf.mxu1 }
 0x220   : > { %v605_v33 = vsel %vm604_vm6, %v601_v31, -inf }
 0x221   : > { %606 = vmax.xlane.f32.xlu1 %v605_v33 }
 0x2aa   : > { %v607_v34 = vpop.xlane.xlu1 %606 }
 0x2ab   : > { %v608_v35 = vsub.f32 %v601_v31, %v607_v34 }
 0x2ad   : > { %v609_v36 = vmul.f32 1.442695, %v608_v35 }
 0x2af   : > { %1248 = vpow2.f32 %v609_v36  ;;  %v943_v36 = vld [vmem:[%s1607_s10 + $0x18] sm:$0xff] }
 0x2bc   : > { %v1249_v37 = vpop.eup %1248 }
 0x2bd   : > { %v611_v38 = vsel %vm604_vm6, %v1249_v37, 0.0 }
 0x2be   : > { %612 = vadd.xlane.f32.xlu1 %v611_v38  ;;  %v941_v38 = vld [vmem:[%s1607_s10 + $0x8] sm:$0xff] }
 0x347   : > { %v613_v41 = vpop.xlane.xlu1 %612 }
 0x348   : > { %1250 = vrcp.f32 %v613_v41 }
 0x355   : > { %v1251_v42 = vpop.eup %1250 }
 0x356   : > { %v1460_v43 = vmul.f32 %v1251_v42, %v1249_v37  ;;  %v942_v37 = vld [vmem:[%s1607_s10 + $0x10] sm:$0xff] }
 0x358   : > { %1201 = vmatmul.mubr.msk.f32.vlgmr.msra.gmra.mxu0 %vm604_vm6, %v1460_v43 }
 0x359   : > { %888 = vmatprep.mubr.f32.mxu0 %v1275_v4  ;;  %841 = vmatpush1.msra.mxu0 %v807_v53  ;;  %v1119_v53 = vld [vmem:[%s1608_s11] ss:$0 sm:$0xff] }
 0x35a   : > { %842 = vmatprep.subr.mxu0 %v806_v58 }
 0x35b   : > { %843 = vmatpush1.msra.mxu0 %v805_v59 }
 0x35c   : > { %844 = vmatprep.subr.mxu0 %v804_v60 }
 0x35d   : > { %845 = vmatpush1.msra.mxu0 %v803_v61 }
 0x35e   : > { %846 = vmatprep.subr.mxu0 %v802_v62 }
 0x35f   : > { %847 = vmatpush1.msra.mxu0 %v801_v63 }
 0x360   : > { %848 = vmatprep.subr.mxu0 %v800_v0 }
 0x361   : > { %849 = vmatpush1.msra.mxu0 %v799_v1 }
 0x362   : > { %850 = vmatprep.subr.mxu0 %v798_v2 }
 0x363   : > { %851 = vmatpush1.msra.mxu0 %v797_v3 }
 0x364   : > { %852 = vmatprep.subr.mxu0 %v796_v5 }
 0x365   : > { %853 = vmatpush1.msra.mxu0 %v795_v6 }
 0x366   : > { %854 = vmatprep.subr.mxu0 %v794_v7 }
 0x367   : > { %855 = vmatpush1.msra.mxu0 %v793_v8 }
 0x418   : > { %v691_v54 = vpop.f32.mrf.mxu0 }
 0x419   : > { %696 = vrot.lane.b32.xlu0 %v691_v54, %s1277_s28 }
 0x41a   : > { %v1202_v55 = vpop.f32.mrf.mxu0 }
 0x48b   : > { %v697_v56 = vpop.permute.xlu0 %696 }
 0x48c   : > { %699 = vst.msk [vmem:[#allocation3] sm:$0xff] %vm513_vm5, %v697_v56 }
 0x493   : > { %v700_v57 = vld [vmem:[#allocation3] sm:$0xff] }
 0x494   : > { %1220 = vmatmul.mubr.msk.f32.vlgmr.msra.gmra.mxu1 %vm433_vm2, %v700_v57 }
 0x495   : > { %1230 = vmatprep.mubr.msk.f32.mxu1 %vm1276_vm1, %v1275_v4  ;;  %1223 = vmatpush3.msra.mxu1 %v943_v36 }
 0x496   : > { %1224 = vmatprep.subr.mxu1 %v1275_v4 }
 0x497   : > { %1225 = vmatpush3.msra.mxu1 %v942_v37 }
 0x498   : > { %1226 = vmatprep.subr.mxu1 %v1275_v4 }
 0x499   : > { %1227 = vmatpush3.msra.mxu1 %v941_v38 }
 0x49a   : > { %1228 = vmatprep.subr.mxu1 %v1275_v4 }
 0x49b   : > { %1229 = vmatpush3.msra.mxu1 %v940_v39 }
 0x554   : > { %v785_v10 = vpop.f32.mrf.mxu1 }
 0x555   : > { %v786_v11 = vadd.f32 %v1114_v9, %v785_v10 }
 0x556   : > { %v1221_v12 = vpop.f32.mrf.mxu1 }
 0x557   : > { %v789_v13 = vmax.f32 %v786_v11, 0.0 }
 0x559   : > { %790 = vst.msk [vmem:[#allocation3] sm:$0xff] %vm507_vm4, %v789_v13 }
 0x55a   : > { %791 = vst.msk [vmem:[#allocation3] sm:$0xff] %vm513_vm5, %v1440_v25 }
 0x561   : > { %v792_v14 = vld [vmem:[#allocation3] sm:$0xff] }
 0x562   : > { %1116 = vmatmul.mubr.msk.f32.vlgmr.msra.gmra.mxu0 %vm433_vm2, %v792_v14 }
 0x622   : > { %v890_v22 = vpop.f32.mrf.mxu0 }
 0x623   : > { %v891_v23 = vadd.f32 %v890_v22, %v814_v20 }
 0x624   : > { %v892_v24 = vpop.f32.mrf.mxu0 }
 0x625   : > { %v893_v26 = vadd.f32 %v892_v24, %v818_v21  ;;  %896 = vrot.lane.b32.xlu1 %v891_v23, %s1277_s28 }
 0x627   : > { %917 = vrot.lane.b32.xlu0 %v893_v26, %s1278_s15 }
 0x697   : > { %v897_v27 = vpop.permute.xlu1 %896 }
 0x698   : > { %v899_v28 = vadd.f32 %v897_v27, %v891_v23 }
 0x699   : > { %v918_v32 = vpop.permute.xlu0 %917 }
 0x69a   : > { %v1117_v16 = vmul.f32 -1.442695, %v899_v28 }
 0x69c   : > { %1252 = vpow2.f32 %v1117_v16 }
 0x6a9   : > { %v1253_v29 = vpop.eup %1252 }
 0x6aa   : > { %v903_v30 = vadd.f32 1.0, %v1253_v29 }
 0x6ac   : > { %1254 = vrcp.f32 %v903_v30 }
 0x6b9   : > { %v1255_v31 = vpop.eup %1254 }
 0x6ba   : > { %v920_v33 = vmul.f32 %v1255_v31, %v918_v32 }
 0x6bc   : > { %922 = vrot.lane.b32.xlu0 %v920_v33, %s1279_s16 }
 0x6c0   : > { %907 = vrot.lane.b32.xlu0 %v893_v26, %s1277_s28 }
 0x72e   : > { %v923_v34 = vpop.permute.xlu0 %922 }
 0x72f   : > { %v925_v35 = vadd.f32 %v923_v34, %v891_v23 }
 0x731   : > { %1256 = vtanh.f32 %v925_v35 }
 0x732   : > { %v908_v41 = vpop.permute.xlu0 %907 }
 0x733   : > { %v910_v42 = vadd.f32 %v908_v41, %v891_v23 }
 0x735   : > { %v1118_v44 = vmul.f32 -1.442695, %v910_v42 }
 0x737   : > { %1258 = vpow2.f32 %v1118_v44 }
 0x73e   : > { %v1257_v40 = vpop.eup %1256 }
 0x73f   : > { %929 = vrot.lane.b32.xlu0 %v1257_v40, %s1278_s15 }
 0x744   : > { %v1259_v45 = vpop.eup %1258 }
 0x745   : > { %v914_v46 = vadd.f32 1.0, %v1259_v45 }
 0x747   : > { %1260 = vrcp.f32 %v914_v46 }
 0x754   : > { %v1261_v47 = vpop.eup %1260 }
 0x755   : > { %v927_v48 = vsub.f32 1.0, %v1261_v47  ;;  %v933_v50 = vmul.f32 %v1261_v47, %v1440_v25 }
 0x7b1   : > { %v930_v49 = vpop.permute.xlu0 %929 }
 0x7b2   : > { %v932_v51 = vmul.f32 %v930_v49, %v927_v48 }
 0x7b4   : > { %v934_v52 = vadd.f32 %v933_v50, %v932_v51 }
 0x7b6   : > { %936 = vrot.lane.b32.xlu1 %v934_v52, %s1278_s15 }
 0x828   : > { %v937_v4 = vpop.permute.xlu1 %936 }
 0x829   : > { %939 = vst.msk [vmem:[#allocation2] sm:$0xff] %vm507_vm4, %v937_v4  ;;  %1231 = vmatmul.mubr.msk.f32.vlgmr.msra.gmra.mxu1 %vm507_vm4, %v937_v4 }
 0x8e9   : > { %v1019_v54 = vpop.f32.mrf.mxu1 }
 0x8ea   : > { %v1020_v55 = vadd.f32 %v1119_v53, %v1019_v54 }
 0x8eb   : > { %v1232_v56 = vpop.f32.mrf.mxu1 }
 0x8ec   : > { %v1023_v57 = vsel %vm433_vm2, %v1020_v55, -inf }
 0x8ed   : > { %1024 = vmax.xlane.f32.xlu0 %v1023_v57 }
 0x903   : > { %1036 = vrot.lane.b32.xlu0 %v934_v52, %s1277_s28 }
 0x976   : > { %v1025_v25 = vpop.xlane.xlu0 %1024 }
 0x977   : > { %v1026_v58 = vsub.f32 %v1020_v55, %v1025_v25 }
 0x979   : > { %v1027_v59 = vmul.f32 1.442695, %v1026_v58 }
 0x97a   : > { %v1037_v3 = vpop.permute.xlu0 %1036 }
 0x97b   : > { %1262 = vpow2.f32 %v1027_v59 }
 0x988   : > { %v1263_v60 = vpop.eup %1262 }
 0x989   : > { %v1029_v61 = vsel %vm433_vm2, %v1263_v60, 0.0 }
 0x98a   : > { %1030 = vadd.xlane.f32.xlu1 %v1029_v61 }
 0x99b   : > { %1039 = vrot.lane.b32.xlu1 %v1460_v43, %s1278_s15 }
 0xa13   : > { %v1031_v62 = vpop.xlane.xlu1 %1030 }
 0xa14   : > { %1264 = vlog2.f32 %v1031_v62 }
 0xa17   : > { %v1040_v5 = vpop.permute.xlu1 %1039 }
 0xa21   : > { %v1265_v63 = vpop.eup %1264 }
 0xa22   : > { %v1033_v0 = vmul.f32 0.6931472, %v1265_v63 }
 0xa24   : > { %v1034_v1 = vadd.f32 %v1033_v0, %v1025_v25 }
 0xa26   : > { %v1035_v2 = vsub.f32 %v1020_v55, %v1034_v1 }
 0xa28   : > { %v1042_v6 = vsel %vm433_vm2, %v1035_v2, %v1037_v3 }
 0xa29   : > { %v1044_v7 = vsel %vm1043_vm8, %v1042_v6, %v1040_v5 }
 0xa2a   : > { %v1046_v8 = vsel %vm1045_vm9, %v1044_v7, 0.0 }
 0xa2b   : > { %1047 = vst [vmem:[%s1359_s30] sm:$0xff] %v1046_v8 }
 0xa2c PF: > { %s22_s21 = sadd.s32 1, %s1272_s21  }
 0xa2d   : > { %p19_p5 = scmp.ge.s32.totalorder %s22_s21, 10  }
 0xa2f   :  { %21 = sbr.rel (!%p19_p5) target bundleno = 1 (0x1), region = 102 }

</bundles_post_ra>
